<compile_context>
chip_gen: v7x
topology: tpu7x:2x2x1
jax: 0.10.0
libtpu: 0.0.40
codegen_flags: <defaults>
</compile_context>

<pallas_src>
import jax
import jax.numpy as jnp
from jax import lax
from jax.experimental import pallas as pl
from jax.experimental.pallas import tpu as pltpu

# ---- problem sizes (small, consistent with RNet) ----
N = 8                                      # batch
C = 4                                      # channels
H = W = 16                                 # spatial
OUT_POOL = (2, 1)                          # RNet default output_num=[2, 1]
NWIN = OUT_POOL[0] * OUT_POOL[0]           # 4 windows at the finest level
WIN = (H // OUT_POOL[0]) * (W // OUT_POOL[0])   # 64 elements per window
CH_LANES = NWIN * WIN                      # 256 lanes per channel in the slab
X_DIM = C * (NWIN + 1)                     # SPP feature dim = 4 * 5 = 20
HID = 32                                   # hid_dim (scaled down from 128)
Z_DIM = 16                                 # z_dim  (scaled down from 64)
BN_EPS = 1e-5
LEAKY = 0.1
SCALE_WEIGHT = 1.0


# ---------------------------------------------------------------------------
# Fused kernel: SPP (hierarchical max) -> (Linear-BN-LeakyReLU) x2 -> Linear
#               -> row L2 normalization * scale_weight
# ---------------------------------------------------------------------------
def _rnet_kernel(x_ref, w1_ref, w2_ref, w3_ref, vec_ref, o_ref):
    # ---- spatial pyramid pooling -------------------------------------------
    # x_ref: (N, C*H*W); lane layout per row: c*256 + (i_out*2 + j_out)*64 + h*8 + w
    win_max = []                                   # win_max[c][w] : (N, 1)
    for c in range(C):
        row = []
        for wdx in range(NWIN):
            s = c * CH_LANES + wdx * WIN
            row.append(jnp.max(x_ref[:, s:s + WIN], axis=1, keepdims=True))
        win_max.append(row)

    # level 0 (2x2) features in PyTorch flatten order (c, i_out, j_out)
    lvl0 = [win_max[c][wdx] for c in range(C) for wdx in range(NWIN)]
    # level 1 (1x1, global max) derived hierarchically from the level-0 maxes
    lvl1 = []
    for c in range(C):
        g = win_max[c][0]
        for wdx in range(1, NWIN):
            g = jnp.maximum(g, win_max[c][wdx])
        lvl1.append(g)
    feat = jnp.concatenate(lvl0 + lvl1, axis=1)    # (N, X_DIM) = torch.cat order

    # ---- Reweighter MLP ------------------------------------------------------
    b1, g1, be1 = vec_ref[0:1, :], vec_ref[1:2, :], vec_ref[2:3, :]
    b2, g2, be2 = vec_ref[3:4, :], vec_ref[4:5, :], vec_ref[5:6, :]
    b3 = vec_ref[6:7, :Z_DIM]

    def dense(h, w_ref, b):
        # default precision (no HIGHEST) -- single MXU pass is plenty at 1e-2 tol
        return jnp.dot(h, w_ref[...], preferred_element_type=jnp.float32) + b

    def bn_lrelu(h, g, be):
        mu = jnp.mean(h, axis=0, keepdims=True)
        var = jnp.mean(jnp.square(h - mu), axis=0, keepdims=True)   # biased var
        hn = (h - mu) * lax.rsqrt(var + BN_EPS) * g + be
        return jnp.where(hn > 0.0, hn, LEAKY * hn)                  # LeakyReLU(0.1)

    h = bn_lrelu(dense(feat, w1_ref, b1), g1, be1)
    h = bn_lrelu(dense(h, w2_ref, b2), g2, be2)
    out = dense(h, w3_ref, b3)                                      # (N, Z_DIM)

    # ---- x / sqrt(sum(x*x, 1)) * scale_weight --------------------------------
    inv = lax.rsqrt(jnp.sum(out * out, axis=1, keepdims=True))
    o_ref[...] = (SCALE_WEIGHT * out) * inv


@jax.jit
def rnet_forward(x, w1, w2, w3, vec):
    s0, k = OUT_POOL[0], H // OUT_POOL[0]
    # Layout plumbing only: ONE transpose to a lane-dense (N, C*H*W) slab where
    # each 8x8 SPP window is contiguous along the lane axis.
    x_slab = jnp.transpose(x.reshape(N, C, s0, k, s0, k),
                           (0, 1, 2, 4, 3, 5)).reshape(N, C * H * W)
    vmem = pl.BlockSpec(memory_space=pltpu.MemorySpace.VMEM)
    return pl.pallas_call(
        _rnet_kernel,
        out_shape=jax.ShapeDtypeStruct((N, Z_DIM), jnp.float32),
        in_specs=[vmem] * 5,
        out_specs=vmem,
    )(x_slab, w1, w2, w3, vec)


# ---------------------------------------------------------------------------
# Pure-JAX reference (mirrors the PyTorch forward) for a sanity check.
# ---------------------------------------------------------------------------
def rnet_reference(x, p):
    feats = []
    for s in OUT_POOL:                               # SPP: exact division, pad = 0
        k = H // s
        m = x.reshape(N, C, s, k, s, k).max(axis=(3, 5))
        feats.append(m.reshape(N, -1))
    h = jnp.concatenate(feats, axis=1)               # (N, X_DIM)

    def dense(h, w, b):
        return jnp.dot(h, w) + b

    def bn_lrelu(h, g, be):
        mu = h.mean(axis=0, keepdims=True)
        var = ((h - mu) ** 2).mean(axis=0, keepdims=True)
        hn = (h - mu) / jnp.sqrt(var + BN_EPS) * g + be
        return jnp.where(hn > 0.0, hn, LEAKY * hn)

    h = bn_lrelu(dense(h, p["w1"], p["b1"]), p["g1"], p["be1"])
    h = bn_lrelu(dense(h, p["w2"], p["b2"]), p["g2"], p["be2"])
    out = dense(h, p["w3"], p["b3"])
    out = out / jnp.sqrt(jnp.sum(out * out, axis=1, keepdims=True))
    return SCALE_WEIGHT * out


def init_params(key):
    ks = jax.random.split(key, 6)
    return {
        "w1": 0.1 * jax.random.normal(ks[0], (X_DIM, HID), jnp.float32),
        "b1": 0.01 * jax.random.normal(ks[1], (HID,), jnp.float32),
        "g1": jnp.ones((HID,), jnp.float32),          # BatchNorm1d weight (default 1)
        "be1": jnp.zeros((HID,), jnp.float32),        # BatchNorm1d bias (default 0)
        "w2": 0.1 * jax.random.normal(ks[2], (HID, HID), jnp.float32),
        "b2": 0.01 * jax.random.normal(ks[3], (HID,), jnp.float32),
        "g2": jnp.ones((HID,), jnp.float32),
        "be2": jnp.zeros((HID,), jnp.float32),
        "w3": 0.1 * jax.random.normal(ks[4], (HID, Z_DIM), jnp.float32),
        "b3": 0.01 * jax.random.normal(ks[5], (Z_DIM,), jnp.float32),
    }


def pack_params(p):
    """Pack the 7 small per-feature vectors into one (8, HID) array (4 DMAs total)."""
    b3_pad = jnp.zeros((HID,), jnp.float32).at[:Z_DIM].set(p["b3"])
    vec = jnp.stack([p["b1"], p["g1"], p["be1"],
                     p["b2"], p["g2"], p["be2"],
                     b3_pad, jnp.zeros((HID,), jnp.float32)], axis=0)   # (8, HID)
    return p["w1"], p["w2"], p["w3"], vec


if __name__ == "__main__":
    key = jax.random.PRNGKey(0)
    kx, kp = jax.random.split(key)
    x = jax.random.normal(kx, (N, C, H, W), jnp.float32)
    params = init_params(kp)
    w1, w2, w3, vec = pack_params(params)

    out = rnet_forward(x, w1, w2, w3, vec)
    out = jax.block_until_ready(out)

    ref = rnet_reference(x, params)
    assert out.shape == (N, Z_DIM), out.shape
    assert jnp.allclose(out, ref, rtol=2e-2, atol=2e-2), (out, ref)
    print("KERNEL_OK")
</pallas_src>

<mosaic_0001>
module attributes {stable_mosaic.version = 11 : i64} {
  func.func @_rnet_kernel(%arg0: memref<8x1024xf32, #tpu.memory_space<vmem>>, %arg1: memref<20x32xf32, #tpu.memory_space<vmem>>, %arg2: memref<32x32xf32, #tpu.memory_space<vmem>>, %arg3: memref<32x16xf32, #tpu.memory_space<vmem>>, %arg4: memref<8x32xf32, #tpu.memory_space<vmem>>, %arg5: memref<8x16xf32, #tpu.memory_space<vmem>>) attributes {dimension_semantics = [], scalar_prefetch = 0 : i64, scratch_operands = 0 : i64, tpu.core_type = #tpu.core_type<tc>} {
    %c0 = arith.constant 0 : index
    %c0_0 = arith.constant 0 : index
    %0 = vector.load %arg0[%c0, %c0_0] : memref<8x1024xf32, #tpu.memory_space<vmem>>, vector<8x64xf32>
    %cst = arith.constant dense<0xFF800000> : vector<8xf32>
    %1 = vector.multi_reduction <maximumf>, %0, %cst [1] : vector<8x64xf32> to vector<8xf32>
    %2 = vector.shape_cast %1 : vector<8xf32> to vector<8x1xf32>
    %c0_1 = arith.constant 0 : index
    %c64 = arith.constant 64 : index
    %3 = vector.load %arg0[%c0_1, %c64] : memref<8x1024xf32, #tpu.memory_space<vmem>>, vector<8x64xf32>
    %cst_2 = arith.constant dense<0xFF800000> : vector<8xf32>
    %4 = vector.multi_reduction <maximumf>, %3, %cst_2 [1] : vector<8x64xf32> to vector<8xf32>
    %5 = vector.shape_cast %4 : vector<8xf32> to vector<8x1xf32>
    %c0_3 = arith.constant 0 : index
    %c128 = arith.constant 128 : index
    %6 = vector.load %arg0[%c0_3, %c128] : memref<8x1024xf32, #tpu.memory_space<vmem>>, vector<8x64xf32>
    %cst_4 = arith.constant dense<0xFF800000> : vector<8xf32>
    %7 = vector.multi_reduction <maximumf>, %6, %cst_4 [1] : vector<8x64xf32> to vector<8xf32>
    %8 = vector.shape_cast %7 : vector<8xf32> to vector<8x1xf32>
    %c0_5 = arith.constant 0 : index
    %c192 = arith.constant 192 : index
    %9 = vector.load %arg0[%c0_5, %c192] : memref<8x1024xf32, #tpu.memory_space<vmem>>, vector<8x64xf32>
    %cst_6 = arith.constant dense<0xFF800000> : vector<8xf32>
    %10 = vector.multi_reduction <maximumf>, %9, %cst_6 [1] : vector<8x64xf32> to vector<8xf32>
    %11 = vector.shape_cast %10 : vector<8xf32> to vector<8x1xf32>
    %c0_7 = arith.constant 0 : index
    %c256 = arith.constant 256 : index
    %12 = vector.load %arg0[%c0_7, %c256] : memref<8x1024xf32, #tpu.memory_space<vmem>>, vector<8x64xf32>
    %cst_8 = arith.constant dense<0xFF800000> : vector<8xf32>
    %13 = vector.multi_reduction <maximumf>, %12, %cst_8 [1] : vector<8x64xf32> to vector<8xf32>
    %14 = vector.shape_cast %13 : vector<8xf32> to vector<8x1xf32>
    %c0_9 = arith.constant 0 : index
    %c320 = arith.constant 320 : index
    %15 = vector.load %arg0[%c0_9, %c320] : memref<8x1024xf32, #tpu.memory_space<vmem>>, vector<8x64xf32>
    %cst_10 = arith.constant dense<0xFF800000> : vector<8xf32>
    %16 = vector.multi_reduction <maximumf>, %15, %cst_10 [1] : vector<8x64xf32> to vector<8xf32>
    %17 = vector.shape_cast %16 : vector<8xf32> to vector<8x1xf32>
    %c0_11 = arith.constant 0 : index
    %c384 = arith.constant 384 : index
    %18 = vector.load %arg0[%c0_11, %c384] : memref<8x1024xf32, #tpu.memory_space<vmem>>, vector<8x64xf32>
    %cst_12 = arith.constant dense<0xFF800000> : vector<8xf32>
    %19 = vector.multi_reduction <maximumf>, %18, %cst_12 [1] : vector<8x64xf32> to vector<8xf32>
    %20 = vector.shape_cast %19 : vector<8xf32> to vector<8x1xf32>
    %c0_13 = arith.constant 0 : index
    %c448 = arith.constant 448 : index
    %21 = vector.load %arg0[%c0_13, %c448] : memref<8x1024xf32, #tpu.memory_space<vmem>>, vector<8x64xf32>
    %cst_14 = arith.constant dense<0xFF800000> : vector<8xf32>
    %22 = vector.multi_reduction <maximumf>, %21, %cst_14 [1] : vector<8x64xf32> to vector<8xf32>
    %23 = vector.shape_cast %22 : vector<8xf32> to vector<8x1xf32>
    %c0_15 = arith.constant 0 : index
    %c512 = arith.constant 512 : index
    %24 = vector.load %arg0[%c0_15, %c512] : memref<8x1024xf32, #tpu.memory_space<vmem>>, vector<8x64xf32>
    %cst_16 = arith.constant dense<0xFF800000> : vector<8xf32>
    %25 = vector.multi_reduction <maximumf>, %24, %cst_16 [1] : vector<8x64xf32> to vector<8xf32>
    %26 = vector.shape_cast %25 : vector<8xf32> to vector<8x1xf32>
    %c0_17 = arith.constant 0 : index
    %c576 = arith.constant 576 : index
    %27 = vector.load %arg0[%c0_17, %c576] : memref<8x1024xf32, #tpu.memory_space<vmem>>, vector<8x64xf32>
    %cst_18 = arith.constant dense<0xFF800000> : vector<8xf32>
    %28 = vector.multi_reduction <maximumf>, %27, %cst_18 [1] : vector<8x64xf32> to vector<8xf32>
    %29 = vector.shape_cast %28 : vector<8xf32> to vector<8x1xf32>
    %c0_19 = arith.constant 0 : index
    %c640 = arith.constant 640 : index
    %30 = vector.load %arg0[%c0_19, %c640] : memref<8x1024xf32, #tpu.memory_space<vmem>>, vector<8x64xf32>
    %cst_20 = arith.constant dense<0xFF800000> : vector<8xf32>
    %31 = vector.multi_reduction <maximumf>, %30, %cst_20 [1] : vector<8x64xf32> to vector<8xf32>
    %32 = vector.shape_cast %31 : vector<8xf32> to vector<8x1xf32>
    %c0_21 = arith.constant 0 : index
    %c704 = arith.constant 704 : index
    %33 = vector.load %arg0[%c0_21, %c704] : memref<8x1024xf32, #tpu.memory_space<vmem>>, vector<8x64xf32>
    %cst_22 = arith.constant dense<0xFF800000> : vector<8xf32>
    %34 = vector.multi_reduction <maximumf>, %33, %cst_22 [1] : vector<8x64xf32> to vector<8xf32>
    %35 = vector.shape_cast %34 : vector<8xf32> to vector<8x1xf32>
    %c0_23 = arith.constant 0 : index
    %c768 = arith.constant 768 : index
    %36 = vector.load %arg0[%c0_23, %c768] : memref<8x1024xf32, #tpu.memory_space<vmem>>, vector<8x64xf32>
    %cst_24 = arith.constant dense<0xFF800000> : vector<8xf32>
    %37 = vector.multi_reduction <maximumf>, %36, %cst_24 [1] : vector<8x64xf32> to vector<8xf32>
    %38 = vector.shape_cast %37 : vector<8xf32> to vector<8x1xf32>
    %c0_25 = arith.constant 0 : index
    %c832 = arith.constant 832 : index
    %39 = vector.load %arg0[%c0_25, %c832] : memref<8x1024xf32, #tpu.memory_space<vmem>>, vector<8x64xf32>
    %cst_26 = arith.constant dense<0xFF800000> : vector<8xf32>
    %40 = vector.multi_reduction <maximumf>, %39, %cst_26 [1] : vector<8x64xf32> to vector<8xf32>
    %41 = vector.shape_cast %40 : vector<8xf32> to vector<8x1xf32>
    %c0_27 = arith.constant 0 : index
    %c896 = arith.constant 896 : index
    %42 = vector.load %arg0[%c0_27, %c896] : memref<8x1024xf32, #tpu.memory_space<vmem>>, vector<8x64xf32>
    %cst_28 = arith.constant dense<0xFF800000> : vector<8xf32>
    %43 = vector.multi_reduction <maximumf>, %42, %cst_28 [1] : vector<8x64xf32> to vector<8xf32>
    %44 = vector.shape_cast %43 : vector<8xf32> to vector<8x1xf32>
    %c0_29 = arith.constant 0 : index
    %c960 = arith.constant 960 : index
    %45 = vector.load %arg0[%c0_29, %c960] : memref<8x1024xf32, #tpu.memory_space<vmem>>, vector<8x64xf32>
    %cst_30 = arith.constant dense<0xFF800000> : vector<8xf32>
    %46 = vector.multi_reduction <maximumf>, %45, %cst_30 [1] : vector<8x64xf32> to vector<8xf32>
    %47 = vector.shape_cast %46 : vector<8xf32> to vector<8x1xf32>
    %48 = arith.maximumf %2, %5 : vector<8x1xf32>
    %49 = arith.maximumf %48, %8 : vector<8x1xf32>
    %50 = arith.maximumf %49, %11 : vector<8x1xf32>
    %51 = arith.maximumf %14, %17 : vector<8x1xf32>
    %52 = arith.maximumf %51, %20 : vector<8x1xf32>
    %53 = arith.maximumf %52, %23 : vector<8x1xf32>
    %54 = arith.maximumf %26, %29 : vector<8x1xf32>
    %55 = arith.maximumf %54, %32 : vector<8x1xf32>
    %56 = arith.maximumf %55, %35 : vector<8x1xf32>
    %57 = arith.maximumf %38, %41 : vector<8x1xf32>
    %58 = arith.maximumf %57, %44 : vector<8x1xf32>
    %59 = arith.maximumf %58, %47 : vector<8x1xf32>
    %60 = tpu.concatenate %2, %5, %8, %11, %14, %17, %20, %23, %26, %29, %32, %35, %38, %41, %44, %47 in 1 : vector<8x1xf32>, vector<8x1xf32>, vector<8x1xf32>, vector<8x1xf32>, vector<8x1xf32>, vector<8x1xf32>, vector<8x1xf32>, vector<8x1xf32>, vector<8x1xf32>, vector<8x1xf32>, vector<8x1xf32>, vector<8x1xf32>, vector<8x1xf32>, vector<8x1xf32>, vector<8x1xf32>, vector<8x1xf32> -> vector<8x16xf32>
    %61 = tpu.concatenate %50, %53, %56, %59 in 1 : vector<8x1xf32>, vector<8x1xf32>, vector<8x1xf32>, vector<8x1xf32> -> vector<8x4xf32>
    %62 = tpu.concatenate %60, %61 in 1 : vector<8x16xf32>, vector<8x4xf32> -> vector<8x20xf32>
    %c0_31 = arith.constant 0 : index
    %c0_32 = arith.constant 0 : index
    %63 = vector.load %arg4[%c0_31, %c0_32] : memref<8x32xf32, #tpu.memory_space<vmem>>, vector<1x32xf32>
    %c1 = arith.constant 1 : index
    %c0_33 = arith.constant 0 : index
    %64 = vector.load %arg4[%c1, %c0_33] : memref<8x32xf32, #tpu.memory_space<vmem>>, vector<1x32xf32>
    %c2 = arith.constant 2 : index
    %c0_34 = arith.constant 0 : index
    %65 = vector.load %arg4[%c2, %c0_34] : memref<8x32xf32, #tpu.memory_space<vmem>>, vector<1x32xf32>
    %c3 = arith.constant 3 : index
    %c0_35 = arith.constant 0 : index
    %66 = vector.load %arg4[%c3, %c0_35] : memref<8x32xf32, #tpu.memory_space<vmem>>, vector<1x32xf32>
    %c4 = arith.constant 4 : index
    %c0_36 = arith.constant 0 : index
    %67 = vector.load %arg4[%c4, %c0_36] : memref<8x32xf32, #tpu.memory_space<vmem>>, vector<1x32xf32>
    %c5 = arith.constant 5 : index
    %c0_37 = arith.constant 0 : index
    %68 = vector.load %arg4[%c5, %c0_37] : memref<8x32xf32, #tpu.memory_space<vmem>>, vector<1x32xf32>
    %c6 = arith.constant 6 : index
    %c0_38 = arith.constant 0 : index
    %69 = vector.load %arg4[%c6, %c0_38] : memref<8x32xf32, #tpu.memory_space<vmem>>, vector<1x16xf32>
    %c0_39 = arith.constant 0 : index
    %c0_40 = arith.constant 0 : index
    %70 = vector.load %arg1[%c0_39, %c0_40] : memref<20x32xf32, #tpu.memory_space<vmem>>, vector<20x32xf32>
    %cst_41 = arith.constant dense<0.000000e+00> : vector<8x32xf32>
    %71 = tpu.matmul %62, %70, %cst_41 {dimension_numbers = #tpu.dot_dimension_numbers<[1], [0], [0], [1], [0, 0, 1, 1], [], []>} : vector<8x20xf32>, vector<20x32xf32>, vector<8x32xf32> -> vector<8x32xf32>
    %72 = vector.broadcast %63 : vector<1x32xf32> to vector<8x32xf32>
    %73 = arith.addf %71, %72 : vector<8x32xf32>
    %cst_42 = arith.constant dense<0.000000e+00> : vector<32xf32>
    %74 = vector.multi_reduction <add>, %73, %cst_42 [0] : vector<8x32xf32> to vector<32xf32>
    %75 = vector.shape_cast %74 : vector<32xf32> to vector<1x32xf32>
    %cst_43 = arith.constant 8.000000e+00 : f32
    %76 = vector.broadcast %cst_43 : f32 to vector<1x32xf32>
    %77 = arith.divf %75, %76 : vector<1x32xf32>
    %78 = vector.broadcast %77 : vector<1x32xf32> to vector<8x32xf32>
    %79 = arith.subf %73, %78 : vector<8x32xf32>
    %80 = arith.mulf %79, %79 : vector<8x32xf32>
    %cst_44 = arith.constant dense<0.000000e+00> : vector<32xf32>
    %81 = vector.multi_reduction <add>, %80, %cst_44 [0] : vector<8x32xf32> to vector<32xf32>
    %82 = vector.shape_cast %81 : vector<32xf32> to vector<1x32xf32>
    %cst_45 = arith.constant 8.000000e+00 : f32
    %83 = vector.broadcast %cst_45 : f32 to vector<1x32xf32>
    %84 = arith.divf %82, %83 : vector<1x32xf32>
    %85 = vector.broadcast %77 : vector<1x32xf32> to vector<8x32xf32>
    %86 = arith.subf %73, %85 : vector<8x32xf32>
    %cst_46 = arith.constant 9.99999974E-6 : f32
    %87 = vector.broadcast %cst_46 : f32 to vector<1x32xf32>
    %88 = arith.addf %84, %87 : vector<1x32xf32>
    %89 = math.rsqrt %88 : vector<1x32xf32>
    %90 = vector.broadcast %89 : vector<1x32xf32> to vector<8x32xf32>
    %91 = arith.mulf %86, %90 : vector<8x32xf32>
    %92 = vector.broadcast %64 : vector<1x32xf32> to vector<8x32xf32>
    %93 = arith.mulf %91, %92 : vector<8x32xf32>
    %94 = vector.broadcast %65 : vector<1x32xf32> to vector<8x32xf32>
    %95 = arith.addf %93, %94 : vector<8x32xf32>
    %cst_47 = arith.constant 0.000000e+00 : f32
    %96 = vector.broadcast %cst_47 : f32 to vector<8x32xf32>
    %97 = arith.cmpf ogt, %95, %96 : vector<8x32xf32>
    %cst_48 = arith.constant 1.000000e-01 : f32
    %98 = vector.broadcast %cst_48 : f32 to vector<8x32xf32>
    %99 = arith.mulf %98, %95 : vector<8x32xf32>
    %100 = arith.select %97, %95, %99 : vector<8x32xi1>, vector<8x32xf32>
    %c0_49 = arith.constant 0 : index
    %c0_50 = arith.constant 0 : index
    %101 = vector.load %arg2[%c0_49, %c0_50] : memref<32x32xf32, #tpu.memory_space<vmem>>, vector<32x32xf32>
    %cst_51 = arith.constant dense<0.000000e+00> : vector<8x32xf32>
    %102 = tpu.matmul %100, %101, %cst_51 {dimension_numbers = #tpu.dot_dimension_numbers<[1], [0], [0], [1], [0, 0, 1, 1], [], []>} : vector<8x32xf32>, vector<32x32xf32>, vector<8x32xf32> -> vector<8x32xf32>
    %103 = vector.broadcast %66 : vector<1x32xf32> to vector<8x32xf32>
    %104 = arith.addf %102, %103 : vector<8x32xf32>
    %cst_52 = arith.constant dense<0.000000e+00> : vector<32xf32>
    %105 = vector.multi_reduction <add>, %104, %cst_52 [0] : vector<8x32xf32> to vector<32xf32>
    %106 = vector.shape_cast %105 : vector<32xf32> to vector<1x32xf32>
    %cst_53 = arith.constant 8.000000e+00 : f32
    %107 = vector.broadcast %cst_53 : f32 to vector<1x32xf32>
    %108 = arith.divf %106, %107 : vector<1x32xf32>
    %109 = vector.broadcast %108 : vector<1x32xf32> to vector<8x32xf32>
    %110 = arith.subf %104, %109 : vector<8x32xf32>
    %111 = arith.mulf %110, %110 : vector<8x32xf32>
    %cst_54 = arith.constant dense<0.000000e+00> : vector<32xf32>
    %112 = vector.multi_reduction <add>, %111, %cst_54 [0] : vector<8x32xf32> to vector<32xf32>
    %113 = vector.shape_cast %112 : vector<32xf32> to vector<1x32xf32>
    %cst_55 = arith.constant 8.000000e+00 : f32
    %114 = vector.broadcast %cst_55 : f32 to vector<1x32xf32>
    %115 = arith.divf %113, %114 : vector<1x32xf32>
    %116 = vector.broadcast %108 : vector<1x32xf32> to vector<8x32xf32>
    %117 = arith.subf %104, %116 : vector<8x32xf32>
    %cst_56 = arith.constant 9.99999974E-6 : f32
    %118 = vector.broadcast %cst_56 : f32 to vector<1x32xf32>
    %119 = arith.addf %115, %118 : vector<1x32xf32>
    %120 = math.rsqrt %119 : vector<1x32xf32>
    %121 = vector.broadcast %120 : vector<1x32xf32> to vector<8x32xf32>
    %122 = arith.mulf %117, %121 : vector<8x32xf32>
    %123 = vector.broadcast %67 : vector<1x32xf32> to vector<8x32xf32>
    %124 = arith.mulf %122, %123 : vector<8x32xf32>
    %125 = vector.broadcast %68 : vector<1x32xf32> to vector<8x32xf32>
    %126 = arith.addf %124, %125 : vector<8x32xf32>
    %cst_57 = arith.constant 0.000000e+00 : f32
    %127 = vector.broadcast %cst_57 : f32 to vector<8x32xf32>
    %128 = arith.cmpf ogt, %126, %127 : vector<8x32xf32>
    %cst_58 = arith.constant 1.000000e-01 : f32
    %129 = vector.broadcast %cst_58 : f32 to vector<8x32xf32>
    %130 = arith.mulf %129, %126 : vector<8x32xf32>
    %131 = arith.select %128, %126, %130 : vector<8x32xi1>, vector<8x32xf32>
    %c0_59 = arith.constant 0 : index
    %c0_60 = arith.constant 0 : index
    %132 = vector.load %arg3[%c0_59, %c0_60] : memref<32x16xf32, #tpu.memory_space<vmem>>, vector<32x16xf32>
    %cst_61 = arith.constant dense<0.000000e+00> : vector<8x16xf32>
    %133 = tpu.matmul %131, %132, %cst_61 {dimension_numbers = #tpu.dot_dimension_numbers<[1], [0], [0], [1], [0, 0, 1, 1], [], []>} : vector<8x32xf32>, vector<32x16xf32>, vector<8x16xf32> -> vector<8x16xf32>
    %134 = vector.broadcast %69 : vector<1x16xf32> to vector<8x16xf32>
    %135 = arith.addf %133, %134 : vector<8x16xf32>
    %136 = arith.mulf %135, %135 : vector<8x16xf32>
    %cst_62 = arith.constant dense<0.000000e+00> : vector<8xf32>
    %137 = vector.multi_reduction <add>, %136, %cst_62 [1] : vector<8x16xf32> to vector<8xf32>
    %138 = vector.shape_cast %137 : vector<8xf32> to vector<8x1xf32>
    %139 = math.rsqrt %138 : vector<8x1xf32>
    %cst_63 = arith.constant 1.000000e+00 : f32
    %140 = vector.broadcast %cst_63 : f32 to vector<8x16xf32>
    %141 = arith.mulf %140, %135 : vector<8x16xf32>
    %142 = vector.broadcast %139 : vector<8x1xf32> to vector<8x16xf32>
    %143 = arith.mulf %141, %142 : vector<8x16xf32>
    %c0_64 = arith.constant 0 : index
    %c0_65 = arith.constant 0 : index
    %144 = vector.load %arg5[%c0_64, %c0_65] : memref<8x16xf32, #tpu.memory_space<vmem>>, vector<8x16xf32>
    tpu.vector_store %arg5[%c0_64, %c0_65], %143 {strides = array<i32>} : memref<8x16xf32, #tpu.memory_space<vmem>>, vector<8x16xf32>,
    return
  }
}

</mosaic_0001>

<bundles_post_ra>
// kernel: rnet_forward.1
= control target key start
LH: loop header
LB: loop body
LE: loop exit
PB: predicated region body
PF: predicated region fallthrough
CT: control target
= control target key end

     0   :  { %vm22_vm0 = vcmask 523264   ;;  %vm26_vm1 = vcmask 1048064   ;;  %s749_s0 = inlined_call_operand.vmem [shape: f32[8,1024], index: 0, kind: input, shape index: {}]   ;;  %s750_s1 = inlined_call_operand.vmem [shape: f32[20,32], index: 1, kind: input, shape index: {}]   ;;  %s751_s2 = inlined_call_operand.vmem [shape: f32[32,32], index: 2, kind: input, shape index: {}]   ;;  %s752_s3 = inlined_call_operand.vmem [shape: f32[32,16], index: 3, kind: input, shape index: {}]   ;;  %s753_s4 = inlined_call_operand.vmem [shape: f32[8,32], index: 4, kind: input, shape index: {}]   ;;  %s754_s5 = inlined_call_operand.hbm [shape: f32[8,16], index: 5, kind: output, shape index: {}]  }
   0x1   :  { %v37_v0 = vld [vmem:[%s749_s0 + $0x10] sm:$0xff]  ;;  %v21_v1 = vld [vmem:[%s749_s0] sm:$0xff] }
   0x2   :  { %v38_v2 = vsel %vm22_vm0, %v37_v0, -inf  ;;  %v23_v3 = vsel %vm22_vm0, %v21_v1, -inf  ;;  %v41_v4 = vsel %vm26_vm1, %v37_v0, -inf  ;;  %v27_v5 = vsel %vm26_vm1, %v21_v1, -inf  ;;  %v51_v6 = vld [vmem:[%s749_s0 + $0x20] sm:$0xff] }
   0x3   :  { %39 = vmax.xlane.f32.xlu1 %v38_v2  ;;  %24 = vmax.xlane.f32.xlu0 %v23_v3 }
   0x4   :  { %10 = vsyncpa [#allocation3], 0  ;;  %v55_v7 = vsel %vm26_vm1, %v51_v6, -inf  ;;  %v52_v8 = vsel %vm22_vm0, %v51_v6, -inf  ;;  %v44_v9 = vld [vmem:[%s749_s0 + $0x18] sm:$0xff]  ;;  %v30_v10 = vld [vmem:[%s749_s0 + $0x8] sm:$0xff] }
   0x5   :  { %v45_v11 = vsel %vm22_vm0, %v44_v9, -inf  ;;  %v31_v12 = vsel %vm22_vm0, %v30_v10, -inf  ;;  %v65_v13 = vld [vmem:[%s749_s0 + $0x30] sm:$0xff]  ;;  %v58_v16 = vld [vmem:[%s749_s0 + $0x28] sm:$0xff]  ;;  %v34_v17 = vsel %vm26_vm1, %v30_v10, -inf  ;;  %v72_v19 = vld [vmem:[%s749_s0 + $0x38] sm:$0xff] }
   0x6   :  { %v69_v14 = vsel %vm26_vm1, %v65_v13, -inf  ;;  %v66_v15 = vsel %vm22_vm0, %v65_v13, -inf  ;;  %v59_v18 = vsel %vm22_vm0, %v58_v16, -inf  ;;  %v73_v20 = vsel %vm22_vm0, %v72_v19, -inf  ;;  %v137_v24 = vld [vmem:[%s750_s1] sm:$0xff]  ;;  %v138_v25 = vld [vmem:[%s750_s1 + $0x8] sm:$0xff] }
   0x7   :  { %42 = vmax.xlane.f32.xlu1 %v41_v4  ;;  %28 = vmax.xlane.f32.xlu0 %v27_v5  ;;  %v48_v21 = vsel %vm26_vm1, %v44_v9, -inf  ;;  %v76_v22 = vsel %vm26_vm1, %v72_v19, -inf  ;;  %v62_v23 = vsel %vm26_vm1, %v58_v16, -inf  ;;  %v581_v26 = vmov 0.0|0.0   ;;  %v139_v41 = vld [vmem:[%s750_s1 + $0x10] sm:$0xf] }
   0x8   :  { %531 = vmatprep.subr.bf16.mxu0 %v581_v26  ;;  %v532_v27 = vpack.c.bf16 %v138_v25, %v137_v24  ;;  %534 = vmatprep.subr.bf16.mxu1 %v581_v26  ;;  %v582_v28 = vmov 0.0   ;;  %vm91_vm2 = vcmask 7168   ;;  %vm93_vm3 = vcmask 15360   ;;  %s584_s1 = smov 16   ;;  %s585_s15 = smov [#allocation2]  }
   0x9   :  { %vm95_vm4 = vcmask 23552   ;;  %vm97_vm5 = vcmask 31744   ;;  %vm148_vm6 = vcmask 1043456   ;;  %vm99_vm7 = vcmask 39936   ;;  %s467_s16 = sshll.u32 %s585_s15, 4  ;;  %s468_s16 = int_to_ptr.vmem [resolvable:$true] %s467_s16 }
   0xa   :  { %533 = vmatpush3.bf16.msra.mxu0 %v532_v27  ;;  %vm583_vm8 = vmmov 0   ;;  %vm101_vm9 = vcmask 48128   ;;  %vm103_vm10 = vcmask 56320   ;;  %vm105_vm11 = vcmask 64512   ;;  %s557_s17 = scalar_lea.vmem %s468_s16, 128  ;;  %p562_p1 = scmp.lt.s32.totalorder %s468_s16, %s468_s16 }
   0xb   :  { %56 = vmax.xlane.f32.xlu1 %v55_v7  ;;  %53 = vmax.xlane.f32.xlu0 %v52_v8  ;;  %vm107_vm12 = vcmask 72704   ;;  %vm109_vm13 = vcmask 80896   ;;  %vm111_vm14 = vcmask 89088   ;;  %vm113_vm15 = vcmask 97280   ;;  %p558_p0 = scmp.ne.s32.totalorder %s468_s16, %s557_s17  ;;  %p563_p2 = scmp.lt.s32.totalorder %s557_s17, %s557_s17 }
   0xc   :  { %504 = vmatprep.subr.mxu0 %v582_v28  ;;  %506 = vmatprep.mubr.msk.f32.mxu0 %vm583_vm8, %v582_v28  ;;  %vm115_vm0 = vcmask 105472   ;;  %vm117_vm1 = vcmask 113664  }
   0xd   :  { %517 = vmatprep.mubr.msk.f32.mxu1 %vm583_vm8, %v582_v28  ;;  %p564_p3 = por %p563_p2, %p562_p1 }
   0xe   :  { %505 = vmatpush3.msk.msra.mxu0 %vm148_vm6, %v139_v41  ;;  %vm128_vm6 = vcmask 130048  }
   0xf   :  { %46 = vmax.xlane.f32.xlu1 %v45_v11  ;;  %32 = vmax.xlane.f32.xlu0 %v31_v12  ;;  %p565_p4 = pnand %p564_p3, %p558_p0 }
  0x10   :  { %540 = vmatprep.subr.bf16.mxu0 %v581_v26 }
  0x13   :  { %70 = vmax.xlane.f32.xlu1 %v69_v14  ;;  %67 = vmax.xlane.f32.xlu0 %v66_v15  ;;  %v258_v14 = vld [vmem:[%s751_s2] sm:$0xff]  ;;  %v259_v15 = vld [vmem:[%s751_s2 + $0x8] sm:$0xff] }
  0x14   :  { %v535_v16 = vpack.c.bf16 %v259_v15, %v258_v14 }
  0x16   :  { %536 = vmatpush3.bf16.msra.mxu1 %v535_v16 }
  0x17   :  { %35 = vmax.xlane.f32.xlu1 %v34_v17  ;;  %60 = vmax.xlane.f32.xlu0 %v59_v18  ;;  %v260_v17 = vld [vmem:[%s751_s2 + $0x10] sm:$0xff]  ;;  %v261_v18 = vld [vmem:[%s751_s2 + $0x18] sm:$0xff] }
  0x18   :  { %537 = vmatprep.subr.bf16.mxu1 %v581_v26  ;;  %v538_v19 = vpack.c.bf16 %v261_v18, %v260_v17  ;;  %v482_v17 = vld [vmem:[%s753_s4 + $0x4] ss:$0 sm:$0xff] }
  0x1a   :  { %539 = vmatpush3.bf16.msra.mxu1 %v538_v19  ;;  %v483_v19 = vld [vmem:[%s753_s4 + $0x5] ss:$0 sm:$0xff] }
  0x1b   :  { %74 = vmax.xlane.f32.xlu1 %v73_v20  ;;  %49 = vmax.xlane.f32.xlu0 %v48_v21  ;;  %v475_v20 = vld [vmem:[%s753_s4] ss:$0 sm:$0xff] }
  0x1f   :  { %77 = vmax.xlane.f32.xlu1 %v76_v22  ;;  %63 = vmax.xlane.f32.xlu0 %v62_v23 }
  0x90   :  { %v40_v29 = vpop.xlane.xlu1 %39  ;;  %v25_v30 = vpop.xlane.xlu0 %24 }
  0x94   :  { %v43_v31 = vpop.xlane.xlu1 %42  ;;  %v29_v32 = vpop.xlane.xlu0 %28 }
  0x95   :  { %v92_v33 = vsel %vm91_vm2, %v25_v30, %v29_v32  ;;  %v82_v45 = vmax.f32 %v40_v29, %v43_v31  ;;  %v79_v48 = vmax.f32 %v25_v30, %v29_v32 }
  0x98   :  { %v57_v34 = vpop.xlane.xlu1 %56  ;;  %v54_v35 = vpop.xlane.xlu0 %53 }
  0x99   :  { %v85_v53 = vmax.f32 %v54_v35, %v57_v34 }
  0x9c   :  { %v47_v36 = vpop.xlane.xlu1 %46  ;;  %v33_v37 = vpop.xlane.xlu0 %32 }
  0x9d   :  { %v94_v38 = vsel %vm93_vm3, %v92_v33, %v33_v37  ;;  %v83_v49 = vmax.f32 %v82_v45, %v47_v36  ;;  %v80_v56 = vmax.f32 %v79_v48, %v33_v37  ;;  %v478_v45 = vld [vmem:[%s753_s4 + $0x1] ss:$0 sm:$0xff] }
  0xa0   :  { %v71_v39 = vpop.xlane.xlu1 %70  ;;  %v68_v40 = vpop.xlane.xlu0 %67 }
  0xa1   :  { %v88_v54 = vmax.f32 %v68_v40, %v71_v39 }
  0xa4   :  { %v36_v42 = vpop.xlane.xlu1 %35  ;;  %v61_v43 = vpop.xlane.xlu0 %60 }
  0xa5   :  { %v96_v44 = vsel %vm95_vm4, %v94_v38, %v36_v42  ;;  %v86_v59 = vmax.f32 %v85_v53, %v61_v43  ;;  %v81_v62 = vmax.f32 %v80_v56, %v36_v42  ;;  %v374_v53 = vld [vmem:[%s752_s3 + $0x8] sm:$0xff]  ;;  %v376_v56 = vld [vmem:[%s752_s3 + $0x18] sm:$0xff] }
  0xa6   :  { %v98_v46 = vsel %vm97_vm5, %v96_v44, %v40_v29  ;;  %vm119_vm5 = vcmask 121856  }
  0xa7   :  { %v100_v47 = vsel %vm99_vm7, %v98_v46, %v43_v31  ;;  %vm144_vm7 = vcmask 162816  }
  0xa8   :  { %v75_v50 = vpop.xlane.xlu1 %74  ;;  %v102_v51 = vsel %vm101_vm9, %v100_v47, %v47_v36  ;;  %v50_v52 = vpop.xlane.xlu0 %49  ;;  %v479_v47 = vld [vmem:[%s753_s4 + $0x2] ss:$0 sm:$0xff] }
  0xa9   :  { %v104_v55 = vsel %vm103_vm10, %v102_v51, %v50_v52  ;;  %v84_v57 = vmax.f32 %v83_v49, %v50_v52  ;;  %v89_v60 = vmax.f32 %v88_v54, %v75_v50  ;;  %v373_v52 = vld [vmem:[%s752_s3] sm:$0xff] }
  0xaa   :  { %v106_v58 = vsel %vm105_vm11, %v104_v55, %v54_v35  ;;  %v541_v54 = vpack.c.bf16 %v374_v53, %v373_v52  ;;  %v375_v55 = vld [vmem:[%s752_s3 + $0x10] sm:$0xff] }
  0xab   :  { %v108_v61 = vsel %vm107_vm12, %v106_v58, %v57_v34  ;;  %v121_v6 = vsel %vm91_vm2, %v81_v62, %v84_v57  ;;  %vm222_vm2 = vcmask 261120   ;;  %v544_v57 = vpack.c.bf16 %v376_v56, %v375_v55  ;;  %v480_v58 = vld [vmem:[%s753_s4 + $0x3] ss:$0 sm:$0xff] }
  0xac   :  { %v78_v63 = vpop.xlane.xlu1 %77  ;;  %v110_v0 = vsel %vm109_vm13, %v108_v61, %v61_v43  ;;  %v64_v1 = vpop.xlane.xlu0 %63 }
  0xad   :  { %v90_v2 = vmax.f32 %v89_v60, %v78_v63  ;;  %v87_v3 = vmax.f32 %v86_v59, %v64_v1  ;;  %v112_v4 = vsel %vm111_vm14, %v110_v0, %v64_v1 }
  0xae   :  { %v114_v5 = vsel %vm113_vm15, %v112_v4, %v68_v40 }
  0xaf   :  { %v116_v7 = vsel %vm115_vm0, %v114_v5, %v71_v39  ;;  %v122_v8 = vsel %vm93_vm3, %v121_v6, %v87_v3 }
  0xb0   :  { %v123_v9 = vsel %vm95_vm4, %v122_v8, %v90_v2  ;;  %v118_v10 = vsel %vm117_vm1, %v116_v7, %v75_v50 }
  0xb1   :  { %125 = vrot.lane.b32.xlu0 %v123_v9, %s584_s1  ;;  %v120_v11 = vsel %vm119_vm5, %v118_v10, %v78_v63 }
 0x123   :  { %v126_v12 = vpop.permute.xlu0 %125 }
 0x124   :  { %v129_v13 = vsel %vm128_vm6, %v120_v11, %v126_v12 }
 0x125   :  { %507 = vmatmul.mubr.msk.f32.vlgmr.msra.gmra.mrb[0].mxu0 %vm144_vm7, %v129_v13 }
 0x126   :  { %528 = vmatprep.mubr.msk.f32.mxu0 %vm583_vm8, %v582_v28  ;;  %542 = vmatpush3.bf16.msra.mxu0 %v541_v54 }
 0x127   :  { %543 = vmatprep.subr.bf16.mxu0 %v581_v26 }
 0x12a   :  { %545 = vmatpush3.bf16.msra.mxu0 %v544_v57 }
 0x1f8   :  { %v218_v21 = vpop.f32.mrb[0].mxu0 }
 0x1f9   :  { %v219_v22 = vadd.f32 %v475_v20, %v218_v21  ;;  %v508_v23 = vpop.f32.mrb[1].mxu0 }
 0x1fb   :  { %v223_v24 = vsel %vm222_vm2, %v219_v22, 0.0 }
 0x1fc   :  { %v224_v25 = vrot.slane %v223_v24, 4 }
 0x1fe   :  { %v225_v27 = vadd.f32 %v224_v25, %v223_v24  ;;  %v484_v24 = vld [vmem:[%s753_s4 + $0x6] ss:$0 sm:$0xff] }
 0x200   :  { %v226_v28 = vrot.slane %v225_v27, 2 }
 0x202   :  { %v227_v29 = vadd.f32 %v226_v28, %v225_v27 }
 0x204   :  { %v228_v30 = vrot.slane %v227_v29, 1 }
 0x206   :  { %v229_v31 = vadd.f32 %v228_v30, %v227_v29 }
 0x208   :  { %v231_v32 = vmul.f32 0.125, %v229_v31 }
 0x20a   :  { %v232_v33 = vsub.f32 %v219_v22, %v231_v32 }
 0x20c   :  { %v233_v34 = vmul.f32 %v232_v33, %v232_v33 }
 0x20e   :  { %v234_v35 = vsel %vm222_vm2, %v233_v34, 0.0 }
 0x20f   :  { %v235_v36 = vrot.slane %v234_v35, 4 }
 0x211   :  { %v236_v37 = vadd.f32 %v235_v36, %v234_v35 }
 0x213   :  { %v237_v38 = vrot.slane %v236_v37, 2 }
 0x215   :  { %v238_v39 = vadd.f32 %v237_v38, %v236_v37 }
 0x217   :  { %v239_v40 = vrot.slane %v238_v39, 1 }
 0x219   :  { %v240_v41 = vadd.f32 %v239_v40, %v238_v39 }
 0x21b   :  { %v241_v42 = vmul.f32 0.125, %v240_v41 }
 0x21d   :  { %v242_v43 = vadd.f32 1e-05, %v241_v42 }
 0x21f   :  { %551 = vrsqrt.f32 %v242_v43 }
 0x229   :  { %v552_v44 = vpop.eup %551 }
 0x22a   :  { %v244_v46 = vmul.f32 %v552_v44, %v232_v33 }
 0x22c   :  { %v249_v48 = vmul.f32 %v478_v45, %v244_v46 }
 0x22e   :  { %v254_v49 = vadd.f32 %v479_v47, %v249_v48 }
 0x230   :  { %vm255_vm3 = vcmp.gt.f32.partialorder %v254_v49, 0.0  ;;  %v256_v50 = vmul.f32 0.1, %v254_v49 }
 0x232   :  { %v257_v51 = vsel %vm255_vm3, %v254_v49, %v256_v50 }
 0x233   :  { %518 = vmatmul.mubr.msk.f32.vlgmr.msra.gmra.mrb[0].mxu1 %vm222_vm2, %v257_v51 }
 0x306   :  { %v335_v59 = vpop.f32.mrb[0].mxu1 }
 0x307   :  { %v336_v60 = vadd.f32 %v480_v58, %v335_v59  ;;  %v519_v61 = vpop.f32.mrb[1].mxu1 }
 0x309   :  { %v339_v62 = vsel %vm222_vm2, %v336_v60, 0.0 }
 0x30a   :  { %v340_v26 = vrot.slane %v339_v62, 4 }
 0x30c   :  { %v341_v63 = vadd.f32 %v340_v26, %v339_v62 }
 0x30e   :  { %v342_v0 = vrot.slane %v341_v63, 2 }
 0x310   :  { %v343_v1 = vadd.f32 %v342_v0, %v341_v63 }
 0x312   :  { %v344_v2 = vrot.slane %v343_v1, 1 }
 0x314   :  { %v345_v3 = vadd.f32 %v344_v2, %v343_v1 }
 0x316   :  { %v346_v4 = vmul.f32 0.125, %v345_v3 }
 0x318   :  { %v347_v5 = vsub.f32 %v336_v60, %v346_v4 }
 0x31a   :  { %v348_v6 = vmul.f32 %v347_v5, %v347_v5 }
 0x31c   :  { %v349_v7 = vsel %vm222_vm2, %v348_v6, 0.0 }
 0x31d   :  { %v350_v8 = vrot.slane %v349_v7, 4 }
 0x31f   :  { %v351_v9 = vadd.f32 %v350_v8, %v349_v7 }
 0x321   :  { %v352_v10 = vrot.slane %v351_v9, 2 }
 0x323   :  { %v353_v11 = vadd.f32 %v352_v10, %v351_v9 }
 0x325   :  { %v354_v12 = vrot.slane %v353_v11, 1 }
 0x327   :  { %v355_v13 = vadd.f32 %v354_v12, %v353_v11 }
 0x329   :  { %v356_v14 = vmul.f32 0.125, %v355_v13 }
 0x32b   :  { %v357_v15 = vadd.f32 1e-05, %v356_v14 }
 0x32d   :  { %553 = vrsqrt.f32 %v357_v15 }
 0x337   :  { %v554_v16 = vpop.eup %553 }
 0x338   :  { %v359_v18 = vmul.f32 %v554_v16, %v347_v5 }
 0x33a   :  { %v364_v20 = vmul.f32 %v482_v17, %v359_v18 }
 0x33c   :  { %v369_v21 = vadd.f32 %v483_v19, %v364_v20 }
 0x33e   :  { %vm370_vm4 = vcmp.gt.f32.partialorder %v369_v21, 0.0  ;;  %v371_v22 = vmul.f32 0.1, %v369_v21 }
 0x340   :  { %v372_v23 = vsel %vm370_vm4, %v369_v21, %v371_v22 }
 0x341   :  { %529 = vmatmul.mubr.msk.f32.vlgmr.msra.gmra.mrb[2].mxu0 %vm222_vm2, %v372_v23 }
 0x414   :  { %v450_v25 = vpop.f32.mrb[2].mxu0 }
 0x415   :  { %v451_v27 = vadd.f32 %v484_v24, %v450_v25  ;;  %v530_v28 = vpop.f32.mrb[3].mxu0 }
 0x417   :  { %v454_v29 = vmul.f32 %v451_v27, %v451_v27 }
 0x419   :  { %v455_v30 = vsel %vm128_vm6, %v454_v29, 0.0 }
 0x41a   :  { %456 = vadd.xlane.f32.xlu1 %v455_v30 }
 0x4a7   :  { %v457_v31 = vpop.xlane.xlu1 %456 }
 0x4a8   :  { %555 = vrsqrt.f32 %v457_v31 }
 0x4b2   :  { %v556_v32 = vpop.eup %555 }
 0x4b3   :  { %v459_v33 = vmul.f32 %v556_v32, %v451_v27 }
 0x4b5   :  { %460 = vst.msk [vmem:[#allocation2] sm:$0xff] %vm128_vm6, %v459_v33 }
 0x4b6   :  { %568 = shalt.err (!%p565_p4)
}
 0x4b7   :  { %s569_s19 = scalar_lea.hbm %s754_s5, 128 }
 0x4b8   :  { %p570_p5 = scmp.ne.s32.totalorder %s754_s5, %s569_s19  ;;  %p573_p6 = scmp.lt.u32.totalorder %s569_s19, %s754_s5 }
 0x4ba   :  { %p575_p7 = pnand %p573_p6, %p570_p5 }
 0x4bc   :  { %578 = shalt.err (!%p575_p7)
}
 0x4bd   :  { %470 = dma.vmem_to_hbm [thread:$0]  %s468_s16, 128, %s754_s5, [#allocation3]  }
 0x4be   :  { %579 = dma.done.wait [#allocation3], 128  }
 0x4bf   :  { %580 = vsyncadd [#allocation3], 4294967168 }
 0x4c0   :  { %474 = vsyncpa [#allocation3], 1 }

</bundles_post_ra>
